<compile_context>
chip_gen: v6e
topology: v6e:2x2x1
jax: 0.10.0
libtpu: 0.0.40
codegen_flags: <defaults>
</compile_context>

<pallas_src>
import functools

import numpy as np

import jax
import jax.numpy as jnp
from jax.experimental import pallas as pl
from jax.experimental.pallas import tpu as pltpu


def _round_up(x, m):
    return (x + m - 1) // m * m


def _postprocess_kernel(logits_ref,   # (bs, tile_tk)  dense logits tile, lane-dense
                        cls_ref,      # (C+1, BQ_pad)  proposal class logits, classes on sublanes
                        seg_ref,      # (2,   BQ_pad)  proposal (center, length) rows
                        base_ref,     # (1,   BQ_pad)  pre-broadcast first-frame index
                        sig_ref,      # (bs, tile_tk)  out: sigmoid(logits) tile
                        slab_ref,     # (4,   BQ_pad)  out: [score, label, start, end]
                        *, window_size, interval):
    # ---- 1) dense frame-level sigmoid (every grid step, software-pipelined) ----
    # Exact tanh identity: one EUP transcendental + mul/add on the VPU.
    x = logits_ref[...].astype(jnp.float32)
    sig_ref[...] = (0.5 * jnp.tanh(0.5 * x) + 0.5).astype(sig_ref.dtype)

    # ---- 2+3) tiny per-query path: only on the first T*K tile -------------------
    @pl.when(pl.program_id(0) == 0)
    def _per_query():
        C1 = cls_ref.shape[0]
        num_fg = C1 - 1

        def row(c):                       # (1, BQ_pad): straight VMEM load per class row
            return cls_ref[pl.ds(c, 1), :].astype(jnp.float32)

        # Unrolled over the tiny static class axis; reductions stay on the VPU,
        # rows come off the (otherwise idle) load slots.
        fg_max = row(0)
        label = jnp.zeros_like(fg_max)
        for c in range(1, num_fg):        # first-argmax on raw foreground logits
            xc = row(c)
            take = xc > fg_max
            fg_max = jnp.where(take, xc, fg_max)
            label = jnp.where(take, jnp.float32(c), label)
        m = jnp.maximum(fg_max, row(C1 - 1))          # overall max incl. background

        s = jnp.exp(row(0) - m)
        for c in range(1, C1):
            s = s + jnp.exp(row(c) - m)               # softmax denominator
        # max foreground softmax prob = exp(max_fg_logit - max_logit) / sum_exp
        scores = jnp.exp(fg_max - m) / s              # exact divide

        # segments: (center, length) -> clamped (start, end) -> absolute frames
        ctr = seg_ref[pl.ds(0, 1), :].astype(jnp.float32)
        length = seg_ref[pl.ds(1, 1), :].astype(jnp.float32)
        base_row = base_ref[...]                      # (1, BQ_pad)
        scale = jnp.float32(window_size * interval)
        start = jnp.clip(ctr - 0.5 * length, 0.0, 1.0) * scale + base_row
        end = jnp.clip(ctr + 0.5 * length, 0.0, 1.0) * scale + base_row

        # One unmasked full-block store of the packed per-query slab.
        slab_ref[...] = jnp.concatenate([scores, label, start, end], axis=0)


@functools.partial(jax.jit, static_argnames=("window_size", "interval"))
def postprocess_pallas(pred_logits, pred_segments, logits, base, *,
                       window_size, interval):
    bs, Q, C1 = pred_logits.shape
    _, T, K = logits.shape
    BQ = bs * Q
    TK = T * K

    BQ_pad = _round_up(BQ, 128)                        # lane-dense per-query slab
    tile_tk = min(1024, _round_up(TK, 128))            # 128..1024, multiple of 128
    TK_pad = _round_up(TK, tile_tk)
    num_tiles = TK_pad // tile_tk

    # Wrapper-side relayout (tiny; fuses into one pre-kernel XLA fusion under jit).
    logits_flat = logits.reshape(bs, TK)
    if TK_pad != TK:
        logits_flat = jnp.pad(logits_flat, ((0, 0), (0, TK_pad - TK)))
    cls_t = jnp.transpose(pred_logits, (2, 0, 1)).reshape(C1, BQ)     # classes on sublanes
    seg_t = jnp.transpose(pred_segments, (2, 0, 1)).reshape(2, BQ)    # (center, length) rows
    base_row = jnp.broadcast_to(base.astype(jnp.float32)[:, None], (bs, Q)).reshape(1, BQ)
    if BQ_pad != BQ:
        pad = ((0, 0), (0, BQ_pad - BQ))
        cls_t = jnp.pad(cls_t, pad)
        seg_t = jnp.pad(seg_t, pad)
        base_row = jnp.pad(base_row, pad)

    kernel = functools.partial(_postprocess_kernel,
                               window_size=window_size, interval=interval)

    out_shapes = (
        jax.ShapeDtypeStruct((bs, TK_pad), jnp.float32),   # sigmoid(logits), lane-dense
        jax.ShapeDtypeStruct((4, BQ_pad), jnp.float32),    # packed [score, label, start, end]
    )

    sig_flat, slab = pl.pallas_call(
        kernel,
        out_shape=out_shapes,
        grid=(num_tiles,),
        in_specs=[
            pl.BlockSpec((bs, tile_tk), lambda t: (0, t)),     # streamed dense tiles
            pl.BlockSpec((C1, BQ_pad), lambda t: (0, 0)),      # resident (fetched once)
            pl.BlockSpec((2, BQ_pad), lambda t: (0, 0)),
            pl.BlockSpec((1, BQ_pad), lambda t: (0, 0)),
        ],
        out_specs=[
            pl.BlockSpec((bs, tile_tk), lambda t: (0, t)),
            pl.BlockSpec((4, BQ_pad), lambda t: (0, 0)),       # grid-invariant slab
        ],
        # "arbitrary": slab output is revisited along this axis (written only at
        # tile 0), so it must not be sharded across v7x's TensorCores.
        compiler_params=pltpu.CompilerParams(dimension_semantics=("arbitrary",)),
    )(logits_flat, cls_t, seg_t, base_row)

    # Post-kernel slicing/reshapes stay inside the jit (single post fusion).
    sig = sig_flat[:, :TK].reshape(bs, T, K)
    scores = slab[0, :BQ].reshape(bs, Q)
    labels = slab[1, :BQ].reshape(bs, Q).astype(jnp.int32)    # exact for classes < 2**24
    segments = jnp.transpose(slab[2:4, :BQ].reshape(2, bs, Q), (1, 2, 0))   # (bs, Q, 2)
    return sig, scores, labels, segments


class PostProcess:
    """JAX/Pallas port of PointTAD's PostProcess module (no learnable params)."""

    def __init__(self, window_size, interval, num_queries, num_classes):
        self.window_size = window_size
        self.interval = interval
        self.num_proposals = num_queries
        self.num_classes = num_classes

    def __call__(self, outputs, num_frames, base):
        out_logits = outputs['pred_logits']
        out_seg = outputs['pred_segments']
        assert out_logits.shape[0] == num_frames.shape[0]
        _ = num_frames.reshape(out_logits.shape[0], 1)   # parity with reference (unused)
        sig_logits, scores, labels, segments = postprocess_pallas(
            out_logits, out_seg, outputs['logits'], base,
            window_size=self.window_size, interval=self.interval)
        # One batched device->host transfer instead of three blocking pulls.
        scores_np, labels_np, segments_np = jax.device_get((scores, labels, segments))
        results = [{'scores': s, 'labels': l, 'segments': b}
                   for s, l, b in zip(scores_np, labels_np, segments_np)]
        return results, sig_logits


if __name__ == "__main__":
    bs, Q, num_classes = 2, 16, 4
    window_size, interval = 32, 2
    T, K = window_size, num_classes            # T*K = 128 -> one lane-dense tile

    key = jax.random.PRNGKey(0)
    k1, k2, k3 = jax.random.split(key, 3)
    pred_logits = jax.random.normal(k1, (bs, Q, num_classes + 1), jnp.float32)
    pred_segments = jax.nn.sigmoid(jax.random.normal(k2, (bs, Q, 2), jnp.float32))
    logits = jax.random.normal(k3, (bs, T, K), jnp.float32)
    base = jnp.array([0.0, 128.0], jnp.float32)
    num_frames = jnp.array([window_size * interval] * bs, jnp.int32)   # unused (parity)

    pp = PostProcess(window_size=window_size, interval=interval,
                     num_queries=Q, num_classes=num_classes)
    results, sig_logits = pp(
        {'pred_logits': pred_logits, 'pred_segments': pred_segments, 'logits': logits},
        num_frames, base)
    jax.block_until_ready(sig_logits)

    # ---- pure-JAX reference check (kernel paths are now exact; tight tols) ------
    prob = jax.nn.softmax(pred_logits, axis=-1)
    ref_scores = jnp.max(prob[..., :-1], axis=-1)
    ref_labels = jnp.argmax(prob[..., :-1], axis=-1)
    c, l = pred_segments[..., 0], pred_segments[..., 1]
    ref_se = jnp.clip(jnp.stack([c - 0.5 * l, c + 0.5 * l], axis=-1), 0.0, 1.0)
    ref_seg = ref_se * (window_size * interval) + base[:, None, None]

    assert np.allclose(np.stack([r['scores'] for r in results]),
                       np.asarray(ref_scores), atol=1e-5)
    assert np.array_equal(np.stack([r['labels'] for r in results]),
                          np.asarray(ref_labels))
    assert np.allclose(np.stack([r['segments'] for r in results]),
                       np.asarray(ref_seg), atol=1e-4)
    assert np.allclose(np.asarray(sig_logits),
                       np.asarray(jax.nn.sigmoid(logits)), atol=1e-5)

    print("KERNEL_OK")
</pallas_src>

<mosaic_0001>
module attributes {stable_mosaic.version = 11 : i64} {
  func.func @_postprocess_kernel(%arg0: i32, %arg1: memref<2x128xf32, #tpu.memory_space<vmem>>, %arg2: memref<5x128xf32, #tpu.memory_space<vmem>>, %arg3: memref<2x128xf32, #tpu.memory_space<vmem>>, %arg4: memref<1x128xf32, #tpu.memory_space<vmem>>, %arg5: memref<2x128xf32, #tpu.memory_space<vmem>>, %arg6: memref<4x128xf32, #tpu.memory_space<vmem>>) attributes {dimension_semantics = [#tpu.dimension_semantics<arbitrary>], iteration_bounds = array<i64: 1>, scalar_prefetch = 0 : i64, scratch_operands = 0 : i64, tpu.core_type = #tpu.core_type<tc>, window_params = [{transform_indices = @transform_0, window_bounds = array<i64: 2, 128>}, {pipeline_mode = #tpu.pipeline_mode<synchronous>, transform_indices = @transform_1, window_bounds = array<i64: 5, 128>}, {pipeline_mode = #tpu.pipeline_mode<synchronous>, transform_indices = @transform_2, window_bounds = array<i64: 2, 128>}, {pipeline_mode = #tpu.pipeline_mode<synchronous>, transform_indices = @transform_3, window_bounds = array<i64: 1, 128>}, {transform_indices = @transform_4, window_bounds = array<i64: 2, 128>}, {pipeline_mode = #tpu.pipeline_mode<synchronous>, transform_indices = @transform_5, window_bounds = array<i64: 4, 128>}]} {
    %c0 = arith.constant 0 : index
    %c0_0 = arith.constant 0 : index
    %0 = vector.load %arg1[%c0, %c0_0] : memref<2x128xf32, #tpu.memory_space<vmem>>, vector<2x128xf32>
    %cst = arith.constant 5.000000e-01 : f32
    %1 = vector.broadcast %cst : f32 to vector<2x128xf32>
    %2 = arith.mulf %1, %0 : vector<2x128xf32>
    %3 = math.tanh %2 : vector<2x128xf32>
    %cst_1 = arith.constant 5.000000e-01 : f32
    %4 = vector.broadcast %cst_1 : f32 to vector<2x128xf32>
    %5 = arith.mulf %4, %3 : vector<2x128xf32>
    %cst_2 = arith.constant 5.000000e-01 : f32
    %6 = vector.broadcast %cst_2 : f32 to vector<2x128xf32>
    %7 = arith.addf %5, %6 : vector<2x128xf32>
    %c0_3 = arith.constant 0 : index
    %c0_4 = arith.constant 0 : index
    %8 = vector.load %arg5[%c0_3, %c0_4] : memref<2x128xf32, #tpu.memory_space<vmem>>, vector<2x128xf32>
    tpu.vector_store %arg5[%c0_3, %c0_4], %7 {strides = array<i32>} : memref<2x128xf32, #tpu.memory_space<vmem>>, vector<2x128xf32>,
    %c0_i32 = arith.constant 0 : i32
    %9 = arith.cmpi eq, %arg0, %c0_i32 : i32
    %10 = arith.extui %9 : i1 to i32
    %c0_i32_5 = arith.constant 0 : i32
    %11 = arith.cmpi ne, %10, %c0_i32_5 : i32
    scf.if %11 {
      %c0_6 = arith.constant 0 : index
      %c0_7 = arith.constant 0 : index
      %12 = vector.load %arg2[%c0_6, %c0_7] : memref<5x128xf32, #tpu.memory_space<vmem>>, vector<1x128xf32>
      %cst_8 = arith.constant 0.000000e+00 : f32
      %13 = vector.broadcast %cst_8 : f32 to vector<1x128xf32>
      %c1 = arith.constant 1 : index
      %c0_9 = arith.constant 0 : index
      %14 = vector.load %arg2[%c1, %c0_9] : memref<5x128xf32, #tpu.memory_space<vmem>>, vector<1x128xf32>
      %15 = arith.cmpf ogt, %14, %12 : vector<1x128xf32>
      %16 = arith.select %15, %14, %12 : vector<1x128xi1>, vector<1x128xf32>
      %cst_10 = arith.constant 1.000000e+00 : f32
      %17 = vector.broadcast %cst_10 : f32 to vector<1x128xf32>
      %18 = arith.select %15, %17, %13 : vector<1x128xi1>, vector<1x128xf32>
      %c2 = arith.constant 2 : index
      %c0_11 = arith.constant 0 : index
      %19 = vector.load %arg2[%c2, %c0_11] : memref<5x128xf32, #tpu.memory_space<vmem>>, vector<1x128xf32>
      %20 = arith.cmpf ogt, %19, %16 : vector<1x128xf32>
      %21 = arith.select %20, %19, %16 : vector<1x128xi1>, vector<1x128xf32>
      %cst_12 = arith.constant 2.000000e+00 : f32
      %22 = vector.broadcast %cst_12 : f32 to vector<1x128xf32>
      %23 = arith.select %20, %22, %18 : vector<1x128xi1>, vector<1x128xf32>
      %c3 = arith.constant 3 : index
      %c0_13 = arith.constant 0 : index
      %24 = vector.load %arg2[%c3, %c0_13] : memref<5x128xf32, #tpu.memory_space<vmem>>, vector<1x128xf32>
      %25 = arith.cmpf ogt, %24, %21 : vector<1x128xf32>
      %26 = arith.select %25, %24, %21 : vector<1x128xi1>, vector<1x128xf32>
      %cst_14 = arith.constant 3.000000e+00 : f32
      %27 = vector.broadcast %cst_14 : f32 to vector<1x128xf32>
      %28 = arith.select %25, %27, %23 : vector<1x128xi1>, vector<1x128xf32>
      %c4 = arith.constant 4 : index
      %c0_15 = arith.constant 0 : index
      %29 = vector.load %arg2[%c4, %c0_15] : memref<5x128xf32, #tpu.memory_space<vmem>>, vector<1x128xf32>
      %30 = arith.maximumf %26, %29 : vector<1x128xf32>
      %c0_16 = arith.constant 0 : index
      %c0_17 = arith.constant 0 : index
      %31 = vector.load %arg2[%c0_16, %c0_17] : memref<5x128xf32, #tpu.memory_space<vmem>>, vector<1x128xf32>
      %32 = arith.subf %31, %30 : vector<1x128xf32>
      %33 = math.exp %32 : vector<1x128xf32>
      %c1_18 = arith.constant 1 : index
      %c0_19 = arith.constant 0 : index
      %34 = vector.load %arg2[%c1_18, %c0_19] : memref<5x128xf32, #tpu.memory_space<vmem>>, vector<1x128xf32>
      %35 = arith.subf %34, %30 : vector<1x128xf32>
      %36 = math.exp %35 : vector<1x128xf32>
      %37 = arith.addf %33, %36 : vector<1x128xf32>
      %c2_20 = arith.constant 2 : index
      %c0_21 = arith.constant 0 : index
      %38 = vector.load %arg2[%c2_20, %c0_21] : memref<5x128xf32, #tpu.memory_space<vmem>>, vector<1x128xf32>
      %39 = arith.subf %38, %30 : vector<1x128xf32>
      %40 = math.exp %39 : vector<1x128xf32>
      %41 = arith.addf %37, %40 : vector<1x128xf32>
      %c3_22 = arith.constant 3 : index
      %c0_23 = arith.constant 0 : index
      %42 = vector.load %arg2[%c3_22, %c0_23] : memref<5x128xf32, #tpu.memory_space<vmem>>, vector<1x128xf32>
      %43 = arith.subf %42, %30 : vector<1x128xf32>
      %44 = math.exp %43 : vector<1x128xf32>
      %45 = arith.addf %41, %44 : vector<1x128xf32>
      %c4_24 = arith.constant 4 : index
      %c0_25 = arith.constant 0 : index
      %46 = vector.load %arg2[%c4_24, %c0_25] : memref<5x128xf32, #tpu.memory_space<vmem>>, vector<1x128xf32>
      %47 = arith.subf %46, %30 : vector<1x128xf32>
      %48 = math.exp %47 : vector<1x128xf32>
      %49 = arith.addf %45, %48 : vector<1x128xf32>
      %50 = arith.subf %26, %30 : vector<1x128xf32>
      %51 = math.exp %50 : vector<1x128xf32>
      %52 = arith.divf %51, %49 : vector<1x128xf32>
      %c0_26 = arith.constant 0 : index
      %c0_27 = arith.constant 0 : index
      %53 = vector.load %arg3[%c0_26, %c0_27] : memref<2x128xf32, #tpu.memory_space<vmem>>, vector<1x128xf32>
      %c1_28 = arith.constant 1 : index
      %c0_29 = arith.constant 0 : index
      %54 = vector.load %arg3[%c1_28, %c0_29] : memref<2x128xf32, #tpu.memory_space<vmem>>, vector<1x128xf32>
      %c0_30 = arith.constant 0 : index
      %c0_31 = arith.constant 0 : index
      %55 = vector.load %arg4[%c0_30, %c0_31] : memref<1x128xf32, #tpu.memory_space<vmem>>, vector<1x128xf32>
      %cst_32 = arith.constant 5.000000e-01 : f32
      %56 = vector.broadcast %cst_32 : f32 to vector<1x128xf32>
      %57 = arith.mulf %56, %54 : vector<1x128xf32>
      %58 = arith.subf %53, %57 : vector<1x128xf32>
      %cst_33 = arith.constant 0.000000e+00 : f32
      %cst_34 = arith.constant 1.000000e+00 : f32
      %59 = vector.broadcast %cst_33 : f32 to vector<1x128xf32>
      %60 = arith.maximumf %59, %58 : vector<1x128xf32>
      %61 = vector.broadcast %cst_34 : f32 to vector<1x128xf32>
      %62 = arith.minimumf %61, %60 : vector<1x128xf32>
      %cst_35 = arith.constant 6.400000e+01 : f32
      %63 = vector.broadcast %cst_35 : f32 to vector<1x128xf32>
      %64 = arith.mulf %62, %63 : vector<1x128xf32>
      %65 = arith.addf %64, %55 : vector<1x128xf32>
      %cst_36 = arith.constant 5.000000e-01 : f32
      %66 = vector.broadcast %cst_36 : f32 to vector<1x128xf32>
      %67 = arith.mulf %66, %54 : vector<1x128xf32>
      %68 = arith.addf %53, %67 : vector<1x128xf32>
      %cst_37 = arith.constant 0.000000e+00 : f32
      %cst_38 = arith.constant 1.000000e+00 : f32
      %69 = vector.broadcast %cst_37 : f32 to vector<1x128xf32>
      %70 = arith.maximumf %69, %68 : vector<1x128xf32>
      %71 = vector.broadcast %cst_38 : f32 to vector<1x128xf32>
      %72 = arith.minimumf %71, %70 : vector<1x128xf32>
      %cst_39 = arith.constant 6.400000e+01 : f32
      %73 = vector.broadcast %cst_39 : f32 to vector<1x128xf32>
      %74 = arith.mulf %72, %73 : vector<1x128xf32>
      %75 = arith.addf %74, %55 : vector<1x128xf32>
      %76 = tpu.concatenate %52, %28, %65, %75 in 0 : vector<1x128xf32>, vector<1x128xf32>, vector<1x128xf32>, vector<1x128xf32> -> vector<4x128xf32>
      %c0_40 = arith.constant 0 : index
      %c0_41 = arith.constant 0 : index
      %77 = vector.load %arg6[%c0_40, %c0_41] : memref<4x128xf32, #tpu.memory_space<vmem>>, vector<4x128xf32>
      tpu.vector_store %arg6[%c0_40, %c0_41], %76 {strides = array<i32>} : memref<4x128xf32, #tpu.memory_space<vmem>>, vector<4x128xf32>,
    } else {
    }
    return
  }
  func.func @transform_0(%arg0: i32) -> (i32, i32) {
    %c0_i32 = arith.constant 0 : i32
    %c0_i32_0 = arith.constant 0 : i32
    return %c0_i32, %arg0 : i32, i32
  }
  func.func @transform_1(%arg0: i32) -> (i32, i32) {
    %c0_i32 = arith.constant 0 : i32
    %c0_i32_0 = arith.constant 0 : i32
    %c0_i32_1 = arith.constant 0 : i32
    return %c0_i32, %c0_i32_0 : i32, i32
  }
  func.func @transform_2(%arg0: i32) -> (i32, i32) {
    %c0_i32 = arith.constant 0 : i32
    %c0_i32_0 = arith.constant 0 : i32
    %c0_i32_1 = arith.constant 0 : i32
    return %c0_i32, %c0_i32_0 : i32, i32
  }
  func.func @transform_3(%arg0: i32) -> (i32, i32) {
    %c0_i32 = arith.constant 0 : i32
    %c0_i32_0 = arith.constant 0 : i32
    %c0_i32_1 = arith.constant 0 : i32
    return %c0_i32, %c0_i32_0 : i32, i32
  }
  func.func @transform_4(%arg0: i32) -> (i32, i32) {
    %c0_i32 = arith.constant 0 : i32
    %c0_i32_0 = arith.constant 0 : i32
    return %c0_i32, %arg0 : i32, i32
  }
  func.func @transform_5(%arg0: i32) -> (i32, i32) {
    %c0_i32 = arith.constant 0 : i32
    %c0_i32_0 = arith.constant 0 : i32
    %c0_i32_1 = arith.constant 0 : i32
    return %c0_i32, %c0_i32_0 : i32, i32
  }
}

</mosaic_0001>

<bundles_post_ra>
// kernel: squeeze.2
= control target key start
LH: loop header
LB: loop body
LE: loop exit
PB: predicated region body
PF: predicated region fallthrough
CT: control target
= control target key end

     0   :  { %s77_s0 = inlined_call_operand.vmem [shape: f32[32], index: 0, kind: input, shape index: {}]   ;;  %s78_s1 = inlined_call_operand.hbm [shape: f32[2,16], index: 1, kind: output, shape index: {}]  }
   0x1   :  { %v6_v0 = vld [vmem:[%s77_s0] sm:$0x1] }
   0x2   :  { %2 = vsyncpa [#allocation1], 0  ;;  %7 = vst [vmem:[#allocation3] sm:$0x1] %v6_v0  ;;  %vm9_vm0 = vcmask 130048   ;;  %s59_s0 = smov 112  }
   0x3   :  { %s60_s8 = smov [#allocation0]  }
   0x4   :  { %s29_s9 = sshll.u32 %s60_s8, 4  ;;  %s30_s9 = int_to_ptr.vmem [resolvable:$true] %s29_s9 }
   0x5   :  { %s37_s10 = scalar_lea.vmem %s30_s9, 32  ;;  %p42_p1 = scmp.lt.s32.totalorder %s30_s9, %s30_s9 }
   0x6   :  { %p38_p0 = scmp.ne.s32.totalorder %s30_s9, %s37_s10  ;;  %p43_p2 = scmp.lt.s32.totalorder %s37_s10, %s37_s10 }
   0x8   :  { %p44_p3 = por %p43_p2, %p42_p1 }
   0x9   :  { %v11_v1 = vld [vmem:[#allocation3] sm:$0x1]  }
   0xa   :  { %v8_v2 = vld [vmem:[#allocation3] sm:$0x1]   ;;  %12 = vrot.lane.b32.xlu0 %v11_v1, %s59_s0  ;;  %p45_p4 = pnand %p44_p3, %p38_p0 }
   0xb   :  { %10 = vst.msk [vmem:[#allocation2] sm:$0x1] %vm9_vm0, %v8_v2  }
  0x7c   :  { %v13_v3 = vpop.permute.xlu0 %12  }
  0x7d   :  { %16 = vst.msk [vmem:[#allocation2 + $0x1] sm:$0x1] %vm9_vm0, %v13_v3  }
  0x84   :  { %v21_v4 = vld [vmem:[#allocation2] sm:$0x3] }
  0x85   :  { %24 = vst [vmem:[#allocation0] sm:$0x3] %v21_v4 }
  0x86   :  { %48 = shalt.err (!%p45_p4)
}
  0x87   :  { %32 = dma.vmem_to_hbm [thread:$0]  %s30_s9, 32, %s78_s1, [#allocation1]  }
  0x88   :  { %57 = dma.done.wait [#allocation1], 32  }
  0x89   :  { %58 = vsyncadd [#allocation1], 4294967264 }
  0x8a   :  { %34 = vsyncpa [#allocation1], 1 }

// kernel: postprocess_pallas.1
= control target key start
LH: loop header
LB: loop body
LE: loop exit
PB: predicated region body
PF: predicated region fallthrough
CT: control target
= control target key end

     0   :  { %v123_v44 = vmov 0.0   ;;  %vm91_vm3 = vcmask 1040384   ;;  %vm93_vm4 = vcmask 1041408   ;;  %vm95_vm5 = vcmask 1042432   ;;  %s193_s0 = inlined_call_operand.vmem [shape: f32[2,128], index: 0, kind: input, shape index: {}]   ;;  %s194_s1 = inlined_call_operand.vmem [shape: f32[5,128], index: 1, kind: input, shape index: {}]   ;;  %s195_s4 = inlined_call_operand.vmem [shape: f32[2,128], index: 4, kind: output, shape index: {0}]   ;;  %s196_s2 = inlined_call_operand.vmem [shape: f32[2,128], index: 2, kind: input, shape index: {}]   ;;  %s197_s3 = inlined_call_operand.vmem [shape: f32[1,128], index: 3, kind: input, shape index: {}]   ;;  %s198_s5 = inlined_call_operand.vmem [shape: f32[4,128], index: 5, kind: output, shape index: {1}]  }
   0x1   :  { %v19_v0 = vld [vmem:[%s193_s0] sm:$0x3]  ;;  %v34_v4 = vld [vmem:[%s194_s1 + $0x2] sm:$0x1]  ;;  %v38_v6 = vld [vmem:[%s194_s1 + $0x3] sm:$0x1] }
   0x2   :  { %v29_v1 = vld [vmem:[%s194_s1] sm:$0x1]  ;;  %v30_v2 = vld [vmem:[%s194_s1 + $0x1] sm:$0x1]  ;;  %v20_v3 = vmul.f32 0.5, %v19_v0 }
   0x3   :  { %vm31_vm0 = vcmp.gt.f32.partialorder %v30_v2, %v29_v1  ;;  %v42_v8 = vld [vmem:[%s194_s1 + $0x4] sm:$0x1]  ;;  %v69_v24 = vld [vmem:[%s196_s2 + $0x1] sm:$0x1]  ;;  %v68_v28 = vld [vmem:[%s196_s2] sm:$0x1] }
   0x4   :  { %v32_v5 = vsel %vm31_vm0, %v30_v2, %v29_v1  ;;  %107 = vtanh.f32 %v20_v3  ;;  %v71_v25 = vmul.f32 0.5, %v69_v24  ;;  %v33_v45 = vsel %vm31_vm0, 1.0, %v123_v44  ;;  %v70_v48 = vld [vmem:[%s197_s3] sm:$0x1] }
   0x5   :  { %vm35_vm1 = vcmp.gt.f32.partialorder %v34_v4, %v32_v5 }
   0x6   :  { %v36_v7 = vsel %vm35_vm1, %v34_v4, %v32_v5  ;;  %v72_v33 = vsub.f32 %v68_v28, %v71_v25  ;;  %v77_v36 = vadd.f32 %v71_v25, %v68_v28  ;;  %v37_v47 = vsel %vm35_vm1, 2.0, %v33_v45 }
   0x7   :  { %vm39_vm2 = vcmp.gt.f32.partialorder %v38_v6, %v36_v7 }
   0x8   :  { %v40_v9 = vsel %vm39_vm2, %v38_v6, %v36_v7  ;;  %v73_v39 = vmax.f32 %v72_v33, 0.0  ;;  %v78_v41 = vmax.f32 %v77_v36, 0.0  ;;  %v41_v50 = vsel %vm39_vm2, 3.0, %v37_v47 }
   0x9   :  { %v43_v10 = vmax.f32 %v40_v9, %v42_v8  ;;  %v83_v54 = vrot.slane %v41_v50, 7 }
   0xa   :  { %v74_v42 = vmin.f32 %v73_v39, 1.0  ;;  %v79_v43 = vmin.f32 %v78_v41, 1.0 }
   0xb   :  { %v44_v11 = vsub.f32 %v29_v1, %v43_v10  ;;  %v47_v12 = vsub.f32 %v30_v2, %v43_v10  ;;  %v51_v13 = vsub.f32 %v34_v4, %v43_v10  ;;  %v55_v14 = vsub.f32 %v38_v6, %v43_v10 }
   0xc   :  { %v59_v15 = vsub.f32 %v42_v8, %v43_v10  ;;  %v63_v27 = vsub.f32 %v40_v9, %v43_v10  ;;  %v75_v46 = vmul.f32 64.0, %v74_v42  ;;  %v80_v49 = vmul.f32 64.0, %v79_v43 }
   0xd   :  { %v45_v16 = vmul.f32 1.442695, %v44_v11  ;;  %v48_v17 = vmul.f32 1.442695, %v47_v12  ;;  %v52_v18 = vmul.f32 1.442695, %v51_v13 }
   0xe   :  { %v56_v19 = vmul.f32 1.442695, %v55_v14  ;;  %v60_v20 = vmul.f32 1.442695, %v59_v15  ;;  %v64_v35 = vmul.f32 1.442695, %v63_v27  ;;  %v76_v51 = vadd.f32 %v75_v46, %v70_v48 }
   0xf   :  { %109 = vpow2.f32 %v45_v16  ;;  %v81_v52 = vadd.f32 %v80_v49, %v70_v48 }
  0x10   :  { %111 = vpow2.f32 %v48_v17  ;;  %v86_v56 = vrot.slane %v76_v51, 6 }
  0x11   :  { %113 = vpow2.f32 %v52_v18  ;;  %v108_v21 = vpop.eup %107  ;;  %v89_v58 = vrot.slane %v81_v52, 5 }
  0x12   :  { %115 = vpow2.f32 %v56_v19  ;;  %v22_v22 = vmul.f32 0.5, %v108_v21 }
  0x13   :  { %117 = vpow2.f32 %v60_v20 }
  0x14   :  { %v23_v23 = vadd.f32 0.5, %v22_v22  ;;  %119 = vpow2.f32 %v64_v35 }
  0x16   :  { %24 = vst [vmem:[%s195_s4] sm:$0x3] %v23_v23 }
  0x1c   :  { %v110_v26 = vpop.eup %109 }
  0x1d   :  { %v112_v29 = vpop.eup %111 }
  0x1e   :  { %v114_v30 = vpop.eup %113  ;;  %v50_v31 = vadd.f32 %v112_v29, %v110_v26 }
  0x1f   :  { %v116_v32 = vpop.eup %115 }
  0x20   :  { %v54_v34 = vadd.f32 %v114_v30, %v50_v31  ;;  %v118_v37 = vpop.eup %117 }
  0x21   :  { %v120_v53 = vpop.eup %119 }
  0x22   :  { %v58_v38 = vadd.f32 %v116_v32, %v54_v34 }
  0x24   :  { %v62_v40 = vadd.f32 %v118_v37, %v58_v38 }
  0x26   :  { %121 = vrcp.f32 %v62_v40 }
  0x33   :  { %v122_v55 = vpop.eup %121 }
  0x34   :  { %v67_v57 = vmul.f32 %v122_v55, %v120_v53 }
  0x36   :  { %v92_v59 = vsel %vm91_vm3, %v67_v57, %v83_v54 }
  0x37   :  { %v94_v60 = vsel %vm93_vm4, %v92_v59, %v86_v56 }
  0x38   :  { %v96_v61 = vsel %vm95_vm5, %v94_v60, %v89_v58 }
  0x39   :  { %97 = vst [vmem:[%s198_s5] sm:$0xf] %v96_v61 }

</bundles_post_ra>
